<compile_context>
chip_gen: v5e
topology: v5e:2x2
jax: 0.10.0
libtpu: 0.0.40
codegen_flags: <defaults>
</compile_context>

<pallas_src>
import math

import jax
import jax.numpy as jnp
from jax.experimental import pallas as pl
from jax.experimental.pallas import tpu as pltpu


def _round_up(x, m):
    return ((x + m - 1) // m) * m


# ---------------------------------------------------------------------------
# Conv path: 3x3 / stride-2 conv as 9 tap-matmuls over even/odd phase slabs.
# ---------------------------------------------------------------------------
def _conv_tap_kernel(p_ref, w_ref, b_ref, o_ref):
    # p_ref: [1, 4, Ho+1, Wo+1, C]  phase slabs of one padded image (x.dtype);
    #        phase index = 2*(row parity) + (col parity)
    # w_ref: [9, C, Cout]           per-tap weights, resident across the grid
    # b_ref: [1, Cout]              f32 bias, resident
    # o_ref: [1, Ho*Wo, Cout]       output tile, final dtype
    _, _, Ho1, Wo1, C = p_ref.shape
    Ho, Wo = Ho1 - 1, Wo1 - 1

    acc = None
    for kh in range(3):
        for kw in range(3):
            ph = 2 * (kh % 2) + (kw % 2)
            dh, dw = kh // 2, kw // 2
            # Contiguous static slice: tap (kh, kw) for every output pixel.
            # padded row 2*ho + kh == phase row (ho + kh//2) of parity kh%2.
            slab = p_ref[0, ph, dh:dh + Ho, dw:dw + Wo, :]       # [Ho, Wo, C]
            slab = slab.reshape(Ho * Wo, C)                      # layout-preserving when Wo % 8 == 0
            part = jnp.dot(slab, w_ref[3 * kh + kw],
                           preferred_element_type=jnp.float32)   # [Ho*Wo, Cout]
            acc = part if acc is None else acc + part
    o_ref[0] = (acc + b_ref[...]).astype(o_ref.dtype)


def downsample_conv2d(x_nchw, weight, bias, padding=1):
    """Conv2d(channels, out_channels, kernel=3, stride=2, padding=padding)."""
    B, C, H, W = x_nchw.shape
    Cout = weight.shape[0]
    Ho = (H + 2 * padding - 3) // 2 + 1
    Wo = (W + 2 * padding - 3) // 2 + 1

    # NHWC + zero pad.  The pad is extended with zeros that no valid tap ever
    # reads, so every phase slab is exactly [Ho+1, Wo+1].
    x_nhwc = jnp.transpose(x_nchw, (0, 2, 3, 1))
    rp_h = max(padding, 2 * Ho + 2 - H - padding)
    rp_w = max(padding, 2 * Wo + 2 - W - padding)
    xp = jnp.pad(x_nhwc, ((0, 0), (padding, rp_h), (padding, rp_w), (0, 0)))

    # Even/odd phase decomposition (XLA fuses pad + strided slice + stack):
    # ~1.06x input bytes written, replacing the old 2.25x im2col materialization.
    he, hodd = slice(0, 2 * Ho + 2, 2), slice(1, 2 * Ho + 2, 2)
    we, wodd = slice(0, 2 * Wo + 2, 2), slice(1, 2 * Wo + 2, 2)
    phases = jnp.stack(
        [xp[:, he, we, :], xp[:, he, wodd, :],
         xp[:, hodd, we, :], xp[:, hodd, wodd, :]],
        axis=1)                                                  # [B, 4, Ho+1, Wo+1, C]

    # Per-tap weights [9, C, Cout]; operands stay at the input precision.
    w_taps = jnp.transpose(weight, (2, 3, 1, 0)).reshape(9, C, Cout).astype(x_nchw.dtype)
    b2d = bias.reshape(1, Cout).astype(jnp.float32)

    out = pl.pallas_call(
        _conv_tap_kernel,
        out_shape=jax.ShapeDtypeStruct((B, Ho * Wo, Cout), x_nchw.dtype),
        grid=(B,),
        in_specs=[
            pl.BlockSpec((1, 4, Ho + 1, Wo + 1, C), lambda b: (b, 0, 0, 0, 0)),
            pl.BlockSpec((9, C, Cout), lambda b: (0, 0, 0)),     # resident weight
            pl.BlockSpec((1, Cout), lambda b: (0, 0)),           # resident bias
        ],
        out_specs=pl.BlockSpec((1, Ho * Wo, Cout), lambda b: (b, 0, 0)),
        compiler_params=pltpu.CompilerParams(
            dimension_semantics=("parallel",),
            vmem_limit_bytes=48 * 1024 * 1024,
        ),
    )(phases, w_taps, b2d)

    # Free reshape + one (small, stride-2-downsampled) output transpose to NCHW.
    y = out.reshape(B, Ho, Wo, Cout)
    return jnp.transpose(y, (0, 3, 1, 2))


# ---------------------------------------------------------------------------
# Avg-pool path: 2x2 / stride-2 average pooling directly on NCHW.
# ---------------------------------------------------------------------------
def _avgpool_kernel(x_ref, s_ref, o_ref):
    # x_ref: [TR, 2, 2*Wo]  row pairs of the NCHW input (x.dtype)
    # s_ref: [2*Wo, Wo]     0/1 column-pair decimation matrix (f32, resident)
    # o_ref: [TR, Wo]       pooled output at the input dtype
    rows = x_ref[:, 0, :].astype(jnp.float32) + x_ref[:, 1, :].astype(jnp.float32)
    pooled = jnp.dot(rows, s_ref[...], preferred_element_type=jnp.float32)
    o_ref[...] = (pooled * 0.25).astype(o_ref.dtype)


def downsample_avgpool2d(x_nchw):
    """AvgPool2d(kernel_size=2, stride=2) with no layout transposes (NCHW in/out)."""
    B, C, H, W = x_nchw.shape
    Ho, Wo = H // 2, W // 2
    W2 = 2 * Wo

    x = x_nchw
    if (H != 2 * Ho) or (W != 2 * Wo):
        # Floor odd sizes, matching PyTorch AvgPool2d(ceil_mode=False).
        x = x[:, :, :2 * Ho, :2 * Wo]
    xv = x.reshape(B * C * Ho, 2, W2)          # free view of the contiguous NCHW array

    # 0/1 matrix folding adjacent column pairs: out[:, k] = in[:, 2k] + in[:, 2k+1].
    sel = (jnp.arange(W2)[:, None] // 2 == jnp.arange(Wo)[None, :]).astype(jnp.float32)

    R = B * C * Ho
    row_bytes = 2 * W2 * x.dtype.itemsize
    budget = 6 * 1024 * 1024                   # per input buffer (x2 for double buffering)
    tr_cap = max(8, (budget // row_bytes) // 8 * 8)
    TR = min(tr_cap, _round_up(pl.cdiv(R, 2), 8))   # >=2 grid steps when possible (v7x 2 TCs)
    TR = max(8, min(TR, _round_up(R, 8)))

    out = pl.pallas_call(
        _avgpool_kernel,
        out_shape=jax.ShapeDtypeStruct((R, Wo), x.dtype),
        grid=(pl.cdiv(R, TR),),
        in_specs=[
            pl.BlockSpec((TR, 2, W2), lambda i: (i, 0, 0)),
            pl.BlockSpec((W2, Wo), lambda i: (0, 0)),            # resident selector
        ],
        out_specs=pl.BlockSpec((TR, Wo), lambda i: (i, 0)),
        compiler_params=pltpu.CompilerParams(
            dimension_semantics=("parallel",),
            vmem_limit_bytes=48 * 1024 * 1024,
        ),
    )(xv, sel)

    return out.reshape(B, C, Ho, Wo)


def downsample(x_nchw, params, use_conv=True, padding=1):
    if use_conv:
        return downsample_conv2d(x_nchw, params["weight"], params["bias"], padding)
    return downsample_avgpool2d(x_nchw)


# ---------------------------------------------------------------------------
# Deterministic parameter init (mirrors nn.Conv2d default init)
# ---------------------------------------------------------------------------
def init_conv_params(key, channels, out_channels, ksize=3):
    fan_in = channels * ksize * ksize
    bound = 1.0 / math.sqrt(fan_in)
    kw, kb = jax.random.split(key)
    weight = jax.random.uniform(
        kw, (out_channels, channels, ksize, ksize), jnp.float32, -bound, bound
    )
    bias = jax.random.uniform(kb, (out_channels,), jnp.float32, -bound, bound)
    return {"weight": weight, "bias": bias}


# ---------------------------------------------------------------------------
# Reference implementations for validation (plain JAX)
# ---------------------------------------------------------------------------
def ref_conv2d(x, weight, bias, padding=1):
    y = jax.lax.conv_general_dilated(
        x, weight, window_strides=(2, 2),
        padding=[(padding, padding), (padding, padding)],
        dimension_numbers=("NCHW", "OIHW", "NCHW"),
        precision=jax.lax.Precision.HIGHEST,
    )
    return y + bias.reshape(1, -1, 1, 1)


def ref_avgpool2d(x):
    y = jax.lax.reduce_window(
        x, 0.0, jax.lax.add,
        window_dimensions=(1, 1, 2, 2), window_strides=(1, 1, 2, 2),
        padding="VALID",
    )
    return y * 0.25


# ---------------------------------------------------------------------------
if __name__ == "__main__":
    key = jax.random.PRNGKey(0)
    kx, kp = jax.random.split(key)

    B, C, H, W = 2, 4, 16, 16
    out_channels = 4
    x = jax.random.normal(kx, (B, C, H, W), jnp.float32)

    # use_conv=True path.  Operands stay f32; tolerance still covers the
    # worst case where the MXU rounds f32 operands to bf16 internally.
    params = init_conv_params(kp, C, out_channels, ksize=3)
    y_conv = jax.block_until_ready(downsample(x, params, use_conv=True, padding=1))
    y_conv_ref = ref_conv2d(x, params["weight"], params["bias"], padding=1)
    assert y_conv.shape == (B, out_channels, H // 2, W // 2), y_conv.shape
    assert jnp.allclose(y_conv, y_conv_ref, atol=5e-2, rtol=5e-2), \
        float(jnp.max(jnp.abs(y_conv - y_conv_ref)))

    # use_conv=False path (avg pool).  The only possible deviation is bf16
    # rounding inside the 0/1 decimation matmul (bounded well below 2e-2).
    y_pool = jax.block_until_ready(downsample(x, params=None, use_conv=False))
    y_pool_ref = ref_avgpool2d(x)
    assert y_pool.shape == (B, C, H // 2, W // 2), y_pool.shape
    assert jnp.allclose(y_pool, y_pool_ref, atol=2e-2, rtol=2e-2), \
        float(jnp.max(jnp.abs(y_pool - y_pool_ref)))

    print("KERNEL_OK")
</pallas_src>

<mosaic_0001>
module attributes {stable_mosaic.version = 11 : i64} {
  func.func @_conv_tap_kernel(%arg0: i32, %arg1: memref<1x4x9x9x4xf32, #tpu.memory_space<vmem>>, %arg2: memref<9x4x4xf32, #tpu.memory_space<vmem>>, %arg3: memref<1x4xf32, #tpu.memory_space<vmem>>, %arg4: memref<1x64x4xf32, #tpu.memory_space<vmem>>) attributes {dimension_semantics = [#tpu.dimension_semantics<parallel>], iteration_bounds = array<i64: 2>, scalar_prefetch = 0 : i64, scratch_operands = 0 : i64, tpu.core_type = #tpu.core_type<tc>, window_params = [{transform_indices = @transform_0, window_bounds = array<i64: 1, 4, 9, 9, 4>}, {pipeline_mode = #tpu.pipeline_mode<synchronous>, transform_indices = @transform_1, window_bounds = array<i64: 9, 4, 4>}, {pipeline_mode = #tpu.pipeline_mode<synchronous>, transform_indices = @transform_2, window_bounds = array<i64: 1, 4>}, {transform_indices = @transform_3, window_bounds = array<i64: 1, 64, 4>}]} {
    %c0 = arith.constant 0 : index
    %c0_0 = arith.constant 0 : index
    %c0_1 = arith.constant 0 : index
    %c0_2 = arith.constant 0 : index
    %c0_3 = arith.constant 0 : index
    %0 = vector.load %arg1[%c0, %c0_0, %c0_1, %c0_2, %c0_3] : memref<1x4x9x9x4xf32, #tpu.memory_space<vmem>>, vector<1x1x8x8x4xf32>
    %1 = vector.shape_cast %0 : vector<1x1x8x8x4xf32> to vector<8x8x4xf32>
    %2 = vector.shape_cast %1 : vector<8x8x4xf32> to vector<64x4xf32>
    %c0_4 = arith.constant 0 : index
    %c0_5 = arith.constant 0 : index
    %c0_6 = arith.constant 0 : index
    %3 = vector.load %arg2[%c0_4, %c0_5, %c0_6] : memref<9x4x4xf32, #tpu.memory_space<vmem>>, vector<1x4x4xf32>
    %4 = vector.shape_cast %3 : vector<1x4x4xf32> to vector<4x4xf32>
    %cst = arith.constant dense<0.000000e+00> : vector<64x4xf32>
    %5 = tpu.matmul %2, %4, %cst {dimension_numbers = #tpu.dot_dimension_numbers<[1], [0], [0], [1], [0, 0, 1, 1], [], []>} : vector<64x4xf32>, vector<4x4xf32>, vector<64x4xf32> -> vector<64x4xf32>
    %c0_7 = arith.constant 0 : index
    %c1 = arith.constant 1 : index
    %c0_8 = arith.constant 0 : index
    %c0_9 = arith.constant 0 : index
    %c0_10 = arith.constant 0 : index
    %6 = vector.load %arg1[%c0_7, %c1, %c0_8, %c0_9, %c0_10] : memref<1x4x9x9x4xf32, #tpu.memory_space<vmem>>, vector<1x1x8x8x4xf32>
    %7 = vector.shape_cast %6 : vector<1x1x8x8x4xf32> to vector<8x8x4xf32>
    %8 = vector.shape_cast %7 : vector<8x8x4xf32> to vector<64x4xf32>
    %c1_11 = arith.constant 1 : index
    %c0_12 = arith.constant 0 : index
    %c0_13 = arith.constant 0 : index
    %9 = vector.load %arg2[%c1_11, %c0_12, %c0_13] : memref<9x4x4xf32, #tpu.memory_space<vmem>>, vector<1x4x4xf32>
    %10 = vector.shape_cast %9 : vector<1x4x4xf32> to vector<4x4xf32>
    %cst_14 = arith.constant dense<0.000000e+00> : vector<64x4xf32>
    %11 = tpu.matmul %8, %10, %cst_14 {dimension_numbers = #tpu.dot_dimension_numbers<[1], [0], [0], [1], [0, 0, 1, 1], [], []>} : vector<64x4xf32>, vector<4x4xf32>, vector<64x4xf32> -> vector<64x4xf32>
    %12 = arith.addf %5, %11 : vector<64x4xf32>
    %c0_15 = arith.constant 0 : index
    %c0_16 = arith.constant 0 : index
    %c0_17 = arith.constant 0 : index
    %c1_18 = arith.constant 1 : index
    %c0_19 = arith.constant 0 : index
    %13 = vector.load %arg1[%c0_15, %c0_16, %c0_17, %c1_18, %c0_19] : memref<1x4x9x9x4xf32, #tpu.memory_space<vmem>>, vector<1x1x8x8x4xf32>
    %14 = vector.shape_cast %13 : vector<1x1x8x8x4xf32> to vector<8x8x4xf32>
    %15 = vector.shape_cast %14 : vector<8x8x4xf32> to vector<64x4xf32>
    %c2 = arith.constant 2 : index
    %c0_20 = arith.constant 0 : index
    %c0_21 = arith.constant 0 : index
    %16 = vector.load %arg2[%c2, %c0_20, %c0_21] : memref<9x4x4xf32, #tpu.memory_space<vmem>>, vector<1x4x4xf32>
    %17 = vector.shape_cast %16 : vector<1x4x4xf32> to vector<4x4xf32>
    %cst_22 = arith.constant dense<0.000000e+00> : vector<64x4xf32>
    %18 = tpu.matmul %15, %17, %cst_22 {dimension_numbers = #tpu.dot_dimension_numbers<[1], [0], [0], [1], [0, 0, 1, 1], [], []>} : vector<64x4xf32>, vector<4x4xf32>, vector<64x4xf32> -> vector<64x4xf32>
    %19 = arith.addf %12, %18 : vector<64x4xf32>
    %c0_23 = arith.constant 0 : index
    %c2_24 = arith.constant 2 : index
    %c0_25 = arith.constant 0 : index
    %c0_26 = arith.constant 0 : index
    %c0_27 = arith.constant 0 : index
    %20 = vector.load %arg1[%c0_23, %c2_24, %c0_25, %c0_26, %c0_27] : memref<1x4x9x9x4xf32, #tpu.memory_space<vmem>>, vector<1x1x8x8x4xf32>
    %21 = vector.shape_cast %20 : vector<1x1x8x8x4xf32> to vector<8x8x4xf32>
    %22 = vector.shape_cast %21 : vector<8x8x4xf32> to vector<64x4xf32>
    %c3 = arith.constant 3 : index
    %c0_28 = arith.constant 0 : index
    %c0_29 = arith.constant 0 : index
    %23 = vector.load %arg2[%c3, %c0_28, %c0_29] : memref<9x4x4xf32, #tpu.memory_space<vmem>>, vector<1x4x4xf32>
    %24 = vector.shape_cast %23 : vector<1x4x4xf32> to vector<4x4xf32>
    %cst_30 = arith.constant dense<0.000000e+00> : vector<64x4xf32>
    %25 = tpu.matmul %22, %24, %cst_30 {dimension_numbers = #tpu.dot_dimension_numbers<[1], [0], [0], [1], [0, 0, 1, 1], [], []>} : vector<64x4xf32>, vector<4x4xf32>, vector<64x4xf32> -> vector<64x4xf32>
    %26 = arith.addf %19, %25 : vector<64x4xf32>
    %c0_31 = arith.constant 0 : index
    %c3_32 = arith.constant 3 : index
    %c0_33 = arith.constant 0 : index
    %c0_34 = arith.constant 0 : index
    %c0_35 = arith.constant 0 : index
    %27 = vector.load %arg1[%c0_31, %c3_32, %c0_33, %c0_34, %c0_35] : memref<1x4x9x9x4xf32, #tpu.memory_space<vmem>>, vector<1x1x8x8x4xf32>
    %28 = vector.shape_cast %27 : vector<1x1x8x8x4xf32> to vector<8x8x4xf32>
    %29 = vector.shape_cast %28 : vector<8x8x4xf32> to vector<64x4xf32>
    %c4 = arith.constant 4 : index
    %c0_36 = arith.constant 0 : index
    %c0_37 = arith.constant 0 : index
    %30 = vector.load %arg2[%c4, %c0_36, %c0_37] : memref<9x4x4xf32, #tpu.memory_space<vmem>>, vector<1x4x4xf32>
    %31 = vector.shape_cast %30 : vector<1x4x4xf32> to vector<4x4xf32>
    %cst_38 = arith.constant dense<0.000000e+00> : vector<64x4xf32>
    %32 = tpu.matmul %29, %31, %cst_38 {dimension_numbers = #tpu.dot_dimension_numbers<[1], [0], [0], [1], [0, 0, 1, 1], [], []>} : vector<64x4xf32>, vector<4x4xf32>, vector<64x4xf32> -> vector<64x4xf32>
    %33 = arith.addf %26, %32 : vector<64x4xf32>
    %c0_39 = arith.constant 0 : index
    %c2_40 = arith.constant 2 : index
    %c0_41 = arith.constant 0 : index
    %c1_42 = arith.constant 1 : index
    %c0_43 = arith.constant 0 : index
    %34 = vector.load %arg1[%c0_39, %c2_40, %c0_41, %c1_42, %c0_43] : memref<1x4x9x9x4xf32, #tpu.memory_space<vmem>>, vector<1x1x8x8x4xf32>
    %35 = vector.shape_cast %34 : vector<1x1x8x8x4xf32> to vector<8x8x4xf32>
    %36 = vector.shape_cast %35 : vector<8x8x4xf32> to vector<64x4xf32>
    %c5 = arith.constant 5 : index
    %c0_44 = arith.constant 0 : index
    %c0_45 = arith.constant 0 : index
    %37 = vector.load %arg2[%c5, %c0_44, %c0_45] : memref<9x4x4xf32, #tpu.memory_space<vmem>>, vector<1x4x4xf32>
    %38 = vector.shape_cast %37 : vector<1x4x4xf32> to vector<4x4xf32>
    %cst_46 = arith.constant dense<0.000000e+00> : vector<64x4xf32>
    %39 = tpu.matmul %36, %38, %cst_46 {dimension_numbers = #tpu.dot_dimension_numbers<[1], [0], [0], [1], [0, 0, 1, 1], [], []>} : vector<64x4xf32>, vector<4x4xf32>, vector<64x4xf32> -> vector<64x4xf32>
    %40 = arith.addf %33, %39 : vector<64x4xf32>
    %c0_47 = arith.constant 0 : index
    %c0_48 = arith.constant 0 : index
    %c1_49 = arith.constant 1 : index
    %c0_50 = arith.constant 0 : index
    %c0_51 = arith.constant 0 : index
    %41 = vector.load %arg1[%c0_47, %c0_48, %c1_49, %c0_50, %c0_51] : memref<1x4x9x9x4xf32, #tpu.memory_space<vmem>>, vector<1x1x8x8x4xf32>
    %42 = vector.shape_cast %41 : vector<1x1x8x8x4xf32> to vector<8x8x4xf32>
    %43 = vector.shape_cast %42 : vector<8x8x4xf32> to vector<64x4xf32>
    %c6 = arith.constant 6 : index
    %c0_52 = arith.constant 0 : index
    %c0_53 = arith.constant 0 : index
    %44 = vector.load %arg2[%c6, %c0_52, %c0_53] : memref<9x4x4xf32, #tpu.memory_space<vmem>>, vector<1x4x4xf32>
    %45 = vector.shape_cast %44 : vector<1x4x4xf32> to vector<4x4xf32>
    %cst_54 = arith.constant dense<0.000000e+00> : vector<64x4xf32>
    %46 = tpu.matmul %43, %45, %cst_54 {dimension_numbers = #tpu.dot_dimension_numbers<[1], [0], [0], [1], [0, 0, 1, 1], [], []>} : vector<64x4xf32>, vector<4x4xf32>, vector<64x4xf32> -> vector<64x4xf32>
    %47 = arith.addf %40, %46 : vector<64x4xf32>
    %c0_55 = arith.constant 0 : index
    %c1_56 = arith.constant 1 : index
    %c1_57 = arith.constant 1 : index
    %c0_58 = arith.constant 0 : index
    %c0_59 = arith.constant 0 : index
    %48 = vector.load %arg1[%c0_55, %c1_56, %c1_57, %c0_58, %c0_59] : memref<1x4x9x9x4xf32, #tpu.memory_space<vmem>>, vector<1x1x8x8x4xf32>
    %49 = vector.shape_cast %48 : vector<1x1x8x8x4xf32> to vector<8x8x4xf32>
    %50 = vector.shape_cast %49 : vector<8x8x4xf32> to vector<64x4xf32>
    %c7 = arith.constant 7 : index
    %c0_60 = arith.constant 0 : index
    %c0_61 = arith.constant 0 : index
    %51 = vector.load %arg2[%c7, %c0_60, %c0_61] : memref<9x4x4xf32, #tpu.memory_space<vmem>>, vector<1x4x4xf32>
    %52 = vector.shape_cast %51 : vector<1x4x4xf32> to vector<4x4xf32>
    %cst_62 = arith.constant dense<0.000000e+00> : vector<64x4xf32>
    %53 = tpu.matmul %50, %52, %cst_62 {dimension_numbers = #tpu.dot_dimension_numbers<[1], [0], [0], [1], [0, 0, 1, 1], [], []>} : vector<64x4xf32>, vector<4x4xf32>, vector<64x4xf32> -> vector<64x4xf32>
    %54 = arith.addf %47, %53 : vector<64x4xf32>
    %c0_63 = arith.constant 0 : index
    %c0_64 = arith.constant 0 : index
    %c1_65 = arith.constant 1 : index
    %c1_66 = arith.constant 1 : index
    %c0_67 = arith.constant 0 : index
    %55 = vector.load %arg1[%c0_63, %c0_64, %c1_65, %c1_66, %c0_67] : memref<1x4x9x9x4xf32, #tpu.memory_space<vmem>>, vector<1x1x8x8x4xf32>
    %56 = vector.shape_cast %55 : vector<1x1x8x8x4xf32> to vector<8x8x4xf32>
    %57 = vector.shape_cast %56 : vector<8x8x4xf32> to vector<64x4xf32>
    %c8 = arith.constant 8 : index
    %c0_68 = arith.constant 0 : index
    %c0_69 = arith.constant 0 : index
    %58 = vector.load %arg2[%c8, %c0_68, %c0_69] : memref<9x4x4xf32, #tpu.memory_space<vmem>>, vector<1x4x4xf32>
    %59 = vector.shape_cast %58 : vector<1x4x4xf32> to vector<4x4xf32>
    %cst_70 = arith.constant dense<0.000000e+00> : vector<64x4xf32>
    %60 = tpu.matmul %57, %59, %cst_70 {dimension_numbers = #tpu.dot_dimension_numbers<[1], [0], [0], [1], [0, 0, 1, 1], [], []>} : vector<64x4xf32>, vector<4x4xf32>, vector<64x4xf32> -> vector<64x4xf32>
    %61 = arith.addf %54, %60 : vector<64x4xf32>
    %c0_71 = arith.constant 0 : index
    %c0_72 = arith.constant 0 : index
    %62 = vector.load %arg3[%c0_71, %c0_72] : memref<1x4xf32, #tpu.memory_space<vmem>>, vector<1x4xf32>
    %63 = vector.broadcast %62 : vector<1x4xf32> to vector<64x4xf32>
    %64 = arith.addf %61, %63 : vector<64x4xf32>
    %c0_73 = arith.constant 0 : index
    %c0_74 = arith.constant 0 : index
    %c0_75 = arith.constant 0 : index
    %65 = vector.load %arg4[%c0_73, %c0_74, %c0_75] : memref<1x64x4xf32, #tpu.memory_space<vmem>>, vector<1x64x4xf32>
    %66 = vector.shape_cast %65 : vector<1x64x4xf32> to vector<64x4xf32>
    %67 = vector.shape_cast %64 : vector<64x4xf32> to vector<1x64x4xf32>
    tpu.vector_store %arg4[%c0_73, %c0_74, %c0_75], %67 {strides = array<i32>} : memref<1x64x4xf32, #tpu.memory_space<vmem>>, vector<1x64x4xf32>,
    return
  }
  func.func @transform_0(%arg0: i32) -> (i32, i32, i32, i32, i32) {
    %c0_i32 = arith.constant 0 : i32
    %c0_i32_0 = arith.constant 0 : i32
    %c0_i32_1 = arith.constant 0 : i32
    %c0_i32_2 = arith.constant 0 : i32
    %c0_i32_3 = arith.constant 0 : i32
    return %arg0, %c0_i32, %c0_i32_0, %c0_i32_1, %c0_i32_2 : i32, i32, i32, i32, i32
  }
  func.func @transform_1(%arg0: i32) -> (i32, i32, i32) {
    %c0_i32 = arith.constant 0 : i32
    %c0_i32_0 = arith.constant 0 : i32
    %c0_i32_1 = arith.constant 0 : i32
    %c0_i32_2 = arith.constant 0 : i32
    return %c0_i32, %c0_i32_0, %c0_i32_1 : i32, i32, i32
  }
  func.func @transform_2(%arg0: i32) -> (i32, i32) {
    %c0_i32 = arith.constant 0 : i32
    %c0_i32_0 = arith.constant 0 : i32
    %c0_i32_1 = arith.constant 0 : i32
    return %c0_i32, %c0_i32_0 : i32, i32
  }
  func.func @transform_3(%arg0: i32) -> (i32, i32, i32) {
    %c0_i32 = arith.constant 0 : i32
    %c0_i32_0 = arith.constant 0 : i32
    %c0_i32_1 = arith.constant 0 : i32
    return %arg0, %c0_i32, %c0_i32_0 : i32, i32, i32
  }
}

</mosaic_0001>

<bundles_post_ra>
// kernel: tpu_custom_call.1
= control target key start
LH: loop header
LB: loop body
LE: loop exit
PB: predicated region body
PF: predicated region fallthrough
CT: control target
= control target key end

     0   :  { %s1207_s12 = smov 0   ;;  %s1517_s0 = inlined_call_operand.vmem [shape: f32[2,4,9,9,4], index: 0, kind: input, shape index: {}]   ;;  %s1518_s1 = inlined_call_operand.vmem [shape: f32[9,4,4], index: 1, kind: input, shape index: {}]   ;;  %s1519_s2 = inlined_call_operand.vmem [shape: f32[1,4], index: 2, kind: input, shape index: {}]   ;;  %s1520_s3 = inlined_call_operand.vmem [shape: f32[2,64,4], index: 3, kind: output, shape index: {}]  }
   0x1 LB: > { %s1010_s13 = sadd.s32 4294967295, %s1185_s12   ;;  %p1014_p0 = scmp.ge.s32.totalorder %s1185_s12, 1  ;;  %s1185_s12 = sphi %s1207_s12, %s13_s12  }
   0x2   : > { %p137_p1 = scmp.lt.s32.totalorder %s1185_s12, 3 }
   0x4   : > { %p138_p2 = pnand %p1014_p0, %p137_p1 }
   0x5   : > { %p161_p3 = scmp.lt.s32.totalorder (!%p138_p2), %s1010_s13, 1 }
   0x6   : > { %141 = sbr.rel (%p138_p2) target bundleno = 295 (0x127), region = 32 }
   0xb   : > { %v1026_v0 = vld [vmem:[%s1518_s1 + $0x4] sm:$0xf]  ;;  %vm216_vm0 = vcmask 1043456   ;;  %v1045_v1 = vld [vmem:[%s1518_s1 + $0x8] sm:$0xf]  ;;  %s1522_s13 = smov (!%p161_p3, %s1010_s13), 1 }
   0xc   : > { %1166 = vmatpush.msk.msra.mxu1 %vm216_vm0, %v1026_v0  ;;  %1167 = vmatpush.msk.msra.mxu2 %vm216_vm0, %v1026_v0  ;;  %v1063_v2 = vld [vmem:[%s1518_s1 + $0xc] sm:$0xf]  ;;  %v179_v3 = vld [vmem:[%s1518_s1] sm:$0xf]  ;;  %v1081_v4 = vld [vmem:[%s1518_s1 + $0x10] sm:$0xf] }
   0xd   : > { %1168 = vmatpush.msk.msra.mxu3 %vm216_vm0, %v1026_v0  ;;  %s1169_s24 = smul.u32 576, %s1522_s13  ;;  %1027 = vmatpush.msk.msra.mxu0 %vm216_vm0, %v1026_v0  ;;  %vm191_vm1 = vcmask 31744   ;;  %v1117_v5 = vld [vmem:[%s1518_s1 + $0x18] sm:$0xf]  ;;  %v1135_v6 = vld [vmem:[%s1518_s1 + $0x1c] sm:$0xf] }
   0xe   : > { %1046 = vmatpush.msk.msrb.mxu2 %vm216_vm0, %v1045_v1  ;;  %1036 = vmatpush.msk.msrb.mxu1 %vm216_vm0, %v179_v3  ;;  %v1099_v11 = vld [vmem:[%s1518_s1 + $0x14] sm:$0xf]  ;;  %v1153_v12 = vld [vmem:[%s1518_s1 + $0x20] sm:$0xf]  ;;  %s1165_s9 = sshll.u32 %s1522_s13, 6 }
   0xf   : > { %1064 = vmatpush.msk.msrb.mxu3 %vm216_vm0, %v1063_v2  ;;  %1082 = vmatpush.msk.msrb.mxu0 %vm216_vm0, %v1081_v4  ;;  %s1244_s27 = scalar_lea.vmem %s1517_s0, %s1169_s24  ;;  %s1467_s16 = scalar_lea.vmem %s1520_s3, %s1165_s9 }
  0x10   : > { %v1253_v7 = vld [vmem:[%s1244_s27 + $0xb0] sm:$0xff]  ;;  %v1280_v13 = vld [vmem:[%s1244_s27 + $0xc0] sm:$0xff] }
  0x11   : > { %v1256_v8 = vld [vmem:[%s1244_s27 + $0xd0] sm:$0xff]  ;;  %1030 = vmatmul.msk.f32.vlgmr.msra.gmra.mxu1 %vm191_vm1, %v1253_v7  ;;  %v1283_v14 = vld [vmem:[%s1244_s27 + $0xe0] sm:$0xff] }
  0x12   : > { %v1259_v9 = vld [vmem:[%s1244_s27 + $0xf0] sm:$0xff]  ;;  %1032 = vmatmul.msk.f32.vlgmr.msra.gmra.mxu2 %vm191_vm1, %v1256_v8  ;;  %1100 = vmatpush.msk.msra.mxu1 %vm216_vm0, %v1099_v11  ;;  %v1286_v15 = vld [vmem:[%s1244_s27 + $0x100] sm:$0xff] }
  0x13   : > { %v1018_v10 = vld [vmem:[%s1244_s27 + $0x90] sm:$0xff]  ;;  %1034 = vmatmul.msk.f32.vlgmr.msra.gmra.mxu3 %vm191_vm1, %v1259_v9  ;;  %1118 = vmatpush.msk.msra.mxu2 %vm216_vm0, %v1117_v5  ;;  %v1289_v16 = vld [vmem:[%s1244_s27 + $0xa0] sm:$0xff] }
  0x14   : > { %1028 = vmatmul.msk.f32.vlgmr.msra.gmra.mxu0 %vm191_vm1, %v1018_v10  ;;  %1136 = vmatpush.msk.msra.mxu3 %vm216_vm0, %v1135_v6  ;;  %v171_v17 = vld [vmem:[%s1244_s27] sm:$0xff]  ;;  %v1073_v20 = vld [vmem:[%s1244_s27 + $0x1b0] sm:$0xff] }
  0x15   : > { %1154 = vmatpush.msk.msra.mxu0 %vm216_vm0, %v1153_v12  ;;  %v329_v18 = vld [vmem:[%s1244_s27 + $0x1] sm:$0xff]  ;;  %v172_v21 = vld [vmem:[%s1244_s27 + $0x10] sm:$0xff] }
  0x16   : > { %v1055_v19 = vld [vmem:[%s1244_s27 + $0x120] sm:$0xff]  ;;  %v330_v22 = vld [vmem:[%s1244_s27 + $0x11] sm:$0xff] }
  0x17   : > { %v1056_v23 = vld [vmem:[%s1244_s27 + $0x130] sm:$0xff]  ;;  %v1074_v24 = vld [vmem:[%s1244_s27 + $0x1c0] sm:$0xff] }
  0x18   : > { %v173_v25 = vld [vmem:[%s1244_s27 + $0x20] sm:$0xff]  ;;  %v1075_v28 = vld [vmem:[%s1244_s27 + $0x1d0] sm:$0xff] }
  0x19   : > { %1031 = vmatmul.msk.f32.gmra.mxu1 %vm191_vm1, %v1280_v13  ;;  %v331_v26 = vld [vmem:[%s1244_s27 + $0x21] sm:$0xff]  ;;  %v174_v29 = vld [vmem:[%s1244_s27 + $0x30] sm:$0xff] }
  0x1a   : > { %1033 = vmatmul.msk.f32.gmra.mxu2 %vm191_vm1, %v1283_v14  ;;  %v1057_v27 = vld [vmem:[%s1244_s27 + $0x140] sm:$0xff]  ;;  %v332_v30 = vld [vmem:[%s1244_s27 + $0x31] sm:$0xff] }
  0x1b   : > { %1035 = vmatmul.msk.f32.gmra.mxu3 %vm191_vm1, %v1286_v15  ;;  %v1058_v31 = vld [vmem:[%s1244_s27 + $0x150] sm:$0xff]  ;;  %v1076_v32 = vld [vmem:[%s1244_s27 + $0x1e0] sm:$0xff] }
  0x1c   : > { %1029 = vmatmul.msk.f32.gmra.mxu0 %vm191_vm1, %v1289_v16  ;;  %v175_v33 = vld [vmem:[%s1244_s27 + $0x40] sm:$0xff]  ;;  %v1077_v36 = vld [vmem:[%s1244_s27 + $0x1f0] sm:$0xff] }
  0x1d   : > { %v333_v34 = vld [vmem:[%s1244_s27 + $0x41] sm:$0xff]  ;;  %v176_v37 = vld [vmem:[%s1244_s27 + $0x50] sm:$0xff] }
  0x1e   : > { %v1059_v35 = vld [vmem:[%s1244_s27 + $0x160] sm:$0xff]  ;;  %v334_v38 = vld [vmem:[%s1244_s27 + $0x51] sm:$0xff] }
  0x1f   : > { %v1060_v39 = vld [vmem:[%s1244_s27 + $0x170] sm:$0xff]  ;;  %v1078_v40 = vld [vmem:[%s1244_s27 + $0x200] sm:$0xff] }
  0x20   : > { %v177_v41 = vld [vmem:[%s1244_s27 + $0x60] sm:$0xff]  ;;  %v1079_v44 = vld [vmem:[%s1244_s27 + $0x210] sm:$0xff] }
  0x21   : > { %1037 = vmatmul.msk.f32.vlgmr.msrb.gmra.mxu1 %vm191_vm1, %v171_v17  ;;  %v335_v42 = vld [vmem:[%s1244_s27 + $0x61] sm:$0xff]  ;;  %v178_v45 = vld [vmem:[%s1244_s27 + $0x70] sm:$0xff] }
  0x22   : > { %1047 = vmatmul.msk.f32.vlgmr.msrb.gmra.mxu2 %vm191_vm1, %v329_v18  ;;  %v1061_v43 = vld [vmem:[%s1244_s27 + $0x180] sm:$0xff]  ;;  %v336_v46 = vld [vmem:[%s1244_s27 + $0x71] sm:$0xff] }
  0x23   : > { %1065 = vmatmul.msk.f32.vlgmr.msrb.gmra.mxu3 %vm191_vm1, %v1055_v19  ;;  %v1062_v47 = vld [vmem:[%s1244_s27 + $0x190] sm:$0xff]  ;;  %v1080_v48 = vld [vmem:[%s1244_s27 + $0x220] sm:$0xff] }
  0x24   : > { %1083 = vmatmul.msk.f32.vlgmr.msrb.gmra.mxu0 %vm191_vm1, %v1073_v20  ;;  %v1091_v49 = vld [vmem:[%s1244_s27 + $0x121] sm:$0xff]  ;;  %v1092_v50 = vld [vmem:[%s1244_s27 + $0x131] sm:$0xff] }
  0x25   : > { %v1093_v51 = vld [vmem:[%s1244_s27 + $0x141] sm:$0xff]  ;;  %v1094_v52 = vld [vmem:[%s1244_s27 + $0x151] sm:$0xff] }
  0x26   : > { %v1095_v53 = vld [vmem:[%s1244_s27 + $0x161] sm:$0xff]  ;;  %v1096_v54 = vld [vmem:[%s1244_s27 + $0x171] sm:$0xff] }
  0x27   : > { %v1097_v56 = vld [vmem:[%s1244_s27 + $0x181] sm:$0xff]  ;;  %v1098_v61 = vld [vmem:[%s1244_s27 + $0x191] sm:$0xff] }
  0x28   : > { %v1116_v62 = vld [vmem:[%s1244_s27 + $0x80] sm:$0xff]  ;;  %v1134_v63 = vld [vmem:[%s1244_s27 + $0x110] sm:$0xff] }
  0x29   : > { %1038 = vmatmul.msk.f32.gmra.mxu1 %vm191_vm1, %v172_v21  ;;  %v1152_v1 = vld [vmem:[%s1244_s27 + $0x81] sm:$0xff] }
  0x2a   : > { %1048 = vmatmul.msk.f32.gmra.mxu2 %vm191_vm1, %v330_v22 }
  0x2b   : > { %1066 = vmatmul.msk.f32.gmra.mxu3 %vm191_vm1, %v1056_v23 }
  0x2c   : > { %1084 = vmatmul.msk.f32.gmra.mxu0 %vm191_vm1, %v1074_v24 }
  0x31   : > { %1039 = vmatmul.msk.f32.gmra.mxu1 %vm191_vm1, %v173_v25 }
  0x32   : > { %1049 = vmatmul.msk.f32.gmra.mxu2 %vm191_vm1, %v331_v26 }
  0x33   : > { %1067 = vmatmul.msk.f32.gmra.mxu3 %vm191_vm1, %v1057_v27 }
  0x34   : > { %1085 = vmatmul.msk.f32.gmra.mxu0 %vm191_vm1, %v1075_v28 }
  0x39   : > { %1040 = vmatmul.msk.f32.gmra.mxu1 %vm191_vm1, %v174_v29 }
  0x3a   : > { %1050 = vmatmul.msk.f32.gmra.mxu2 %vm191_vm1, %v332_v30 }
  0x3b   : > { %1068 = vmatmul.msk.f32.gmra.mxu3 %vm191_vm1, %v1058_v31 }
  0x3c   : > { %1086 = vmatmul.msk.f32.gmra.mxu0 %vm191_vm1, %v1076_v32 }
  0x41   : > { %1041 = vmatmul.msk.f32.gmra.mxu1 %vm191_vm1, %v175_v33 }
  0x42   : > { %1051 = vmatmul.msk.f32.gmra.mxu2 %vm191_vm1, %v333_v34 }
  0x43   : > { %1069 = vmatmul.msk.f32.gmra.mxu3 %vm191_vm1, %v1059_v35 }
  0x44   : > { %1087 = vmatmul.msk.f32.gmra.mxu0 %vm191_vm1, %v1077_v36 }
  0x49   : > { %1042 = vmatmul.msk.f32.gmra.mxu1 %vm191_vm1, %v176_v37 }
  0x4a   : > { %1052 = vmatmul.msk.f32.gmra.mxu2 %vm191_vm1, %v334_v38 }
  0x4b   : > { %1070 = vmatmul.msk.f32.gmra.mxu3 %vm191_vm1, %v1060_v39 }
  0x4c   : > { %1088 = vmatmul.msk.f32.gmra.mxu0 %vm191_vm1, %v1078_v40 }
  0x51   : > { %1043 = vmatmul.msk.f32.gmra.mxu1 %vm191_vm1, %v177_v41 }
  0x52   : > { %1053 = vmatmul.msk.f32.gmra.mxu2 %vm191_vm1, %v335_v42 }
  0x53   : > { %1071 = vmatmul.msk.f32.gmra.mxu3 %vm191_vm1, %v1061_v43 }
  0x54   : > { %1089 = vmatmul.msk.f32.gmra.mxu0 %vm191_vm1, %v1079_v44 }
  0x59   : > { %1044 = vmatmul.msk.f32.gmra.mxu1 %vm191_vm1, %v178_v45 }
  0x5a   : > { %1054 = vmatmul.msk.f32.gmra.mxu2 %vm191_vm1, %v336_v46 }
  0x5b   : > { %1072 = vmatmul.msk.f32.gmra.mxu3 %vm191_vm1, %v1062_v47 }
  0x5c   : > { %1090 = vmatmul.msk.f32.gmra.mxu0 %vm191_vm1, %v1080_v48 }
  0x61   : > { %1101 = vmatmul.msk.f32.vlgmr.msra.gmra.mxu1 %vm191_vm1, %v1091_v49 }
  0x62   : > { %1119 = vmatmul.msk.f32.vlgmr.msra.gmra.mxu2 %vm191_vm1, %v172_v21 }
  0x63   : > { %1137 = vmatmul.msk.f32.vlgmr.msra.gmra.mxu3 %vm191_vm1, %v1289_v16 }
  0x64   : > { %1155 = vmatmul.msk.f32.vlgmr.msra.gmra.mxu0 %vm191_vm1, %v330_v22 }
  0x69   : > { %1102 = vmatmul.msk.f32.gmra.mxu1 %vm191_vm1, %v1092_v50 }
  0x6a   : > { %1120 = vmatmul.msk.f32.gmra.mxu2 %vm191_vm1, %v173_v25 }
  0x6b   : > { %1138 = vmatmul.msk.f32.gmra.mxu3 %vm191_vm1, %v1253_v7 }
  0x6c   : > { %1156 = vmatmul.msk.f32.gmra.mxu0 %vm191_vm1, %v331_v26 }
  0x71   : > { %1103 = vmatmul.msk.f32.gmra.mxu1 %vm191_vm1, %v1093_v51 }
  0x72   : > { %1121 = vmatmul.msk.f32.gmra.mxu2 %vm191_vm1, %v174_v29 }
  0x73   : > { %1139 = vmatmul.msk.f32.gmra.mxu3 %vm191_vm1, %v1280_v13 }
  0x74   : > { %1157 = vmatmul.msk.f32.gmra.mxu0 %vm191_vm1, %v332_v30 }
  0x79   : > { %1104 = vmatmul.msk.f32.gmra.mxu1 %vm191_vm1, %v1094_v52  ;;  %v1462_v52 = vld [vmem:[%s1519_s2] ss:$0 sm:$0xff] }
  0x7a   : > { %1122 = vmatmul.msk.f32.gmra.mxu2 %vm191_vm1, %v175_v33 }
  0x7b   : > { %1140 = vmatmul.msk.f32.gmra.mxu3 %vm191_vm1, %v1256_v8 }
  0x7c   : > { %1158 = vmatmul.msk.f32.gmra.mxu0 %vm191_vm1, %v333_v34 }
  0x81   : > { %1105 = vmatmul.msk.f32.gmra.mxu1 %vm191_vm1, %v1095_v53 }
  0x82   : > { %1123 = vmatmul.msk.f32.gmra.mxu2 %vm191_vm1, %v176_v37 }
  0x83   : > { %1141 = vmatmul.msk.f32.gmra.mxu3 %vm191_vm1, %v1283_v14 }
  0x84   : > { %1159 = vmatmul.msk.f32.gmra.mxu0 %vm191_vm1, %v334_v38 }
  0x89   : > { %1106 = vmatmul.msk.f32.gmra.mxu1 %vm191_vm1, %v1096_v54 }
  0x8a   : > { %1124 = vmatmul.msk.f32.gmra.mxu2 %vm191_vm1, %v177_v41 }
  0x8b   : > { %1142 = vmatmul.msk.f32.gmra.mxu3 %vm191_vm1, %v1259_v9 }
  0x8c   : > { %1160 = vmatmul.msk.f32.gmra.mxu0 %vm191_vm1, %v335_v42 }
  0x8e   : > { %v1399_v55 = vpop.f32.mrf.mxu1 }
  0x91   : > { %v237_v57 = vpop.f32.mrf.mxu0  ;;  %1107 = vmatmul.msk.f32.gmra.mxu1 %vm191_vm1, %v1097_v56 }
  0x92   : > { %1125 = vmatmul.msk.f32.gmra.mxu2 %vm191_vm1, %v178_v45 }
  0x93   : > { %1143 = vmatmul.msk.f32.gmra.mxu3 %vm191_vm1, %v1286_v15 }
  0x94   : > { %1161 = vmatmul.msk.f32.gmra.mxu0 %vm191_vm1, %v336_v46 }
  0x95   : > { %v1407_v58 = vpop.f32.mrf.mxu2 }
  0x96   : > { %v1409_v59 = vpop.f32.mrf.mxu3  ;;  %v1411_v60 = vpop.f32.mrf.mxu1 }
  0x99   : > { %v240_v0 = vpop.f32.mrf.mxu0  ;;  %1108 = vmatmul.msk.f32.gmra.mxu1 %vm191_vm1, %v1098_v61 }
  0x9a   : > { %1126 = vmatmul.msk.f32.gmra.mxu2 %vm191_vm1, %v1116_v62 }
  0x9b   : > { %1144 = vmatmul.msk.f32.gmra.mxu3 %vm191_vm1, %v1134_v63 }
  0x9c   : > { %1162 = vmatmul.msk.f32.gmra.mxu0 %vm191_vm1, %v1152_v1 }
  0x9d   : > { %v1421_v2 = vpop.f32.mrf.mxu2 }
  0x9e   : > { %v1423_v3 = vpop.f32.mrf.mxu3  ;;  %v305_v4 = vpop.f32.mrf.mxu1 }
  0x9f   : > { %v306_v33 = vadd.f32 %v305_v4, %v237_v57 }
  0xa1   : > { %v557_v5 = vpop.f32.mrf.mxu0 }
  0xa5   : > { %v383_v6 = vpop.f32.mrf.mxu2 }
  0xa6   : > { %v470_v7 = vpop.f32.mrf.mxu3  ;;  %v308_v8 = vpop.f32.mrf.mxu1  ;;  %v407_v35 = vadd.f32 %v383_v6, %v306_v33 }
  0xa7   : > { %v309_v40 = vadd.f32 %v308_v8, %v240_v0 }
  0xa8   : > { %v494_v37 = vadd.f32 %v470_v7, %v407_v35 }
  0xa9   : > { %v560_v9 = vpop.f32.mrf.mxu0 }
  0xaa   : > { %v581_v42 = vadd.f32 %v557_v5, %v494_v37 }
  0xad   : > { %v386_v10 = vpop.f32.mrf.mxu2 }
  0xae   : > { %v473_v11 = vpop.f32.mrf.mxu3  ;;  %v311_v12 = vpop.f32.mrf.mxu1  ;;  %v408_v43 = vadd.f32 %v386_v10, %v309_v40 }
  0xaf   : > { %v312_v50 = vadd.f32 %v311_v12, %v1399_v55 }
  0xb0   : > { %v495_v46 = vadd.f32 %v473_v11, %v408_v43 }
  0xb1   : > { %v563_v13 = vpop.f32.mrf.mxu0 }
  0xb2   : > { %v582_v54 = vadd.f32 %v560_v9, %v495_v46 }
  0xb5   : > { %v389_v14 = vpop.f32.mrf.mxu2 }
  0xb6   : > { %v476_v15 = vpop.f32.mrf.mxu3  ;;  %v314_v16 = vpop.f32.mrf.mxu1  ;;  %v409_v56 = vadd.f32 %v389_v14, %v312_v50 }
  0xb7   : > { %v315_v5 = vadd.f32 %v314_v16, %v1411_v60 }
  0xb8   : > { %v496_v63 = vadd.f32 %v476_v15, %v409_v56 }
  0xb9   : > { %v1425_v17 = vpop.f32.mrf.mxu0 }
  0xba   : > { %v583_v8 = vadd.f32 %v563_v13, %v496_v63 }
  0xbd   : > { %v392_v18 = vpop.f32.mrf.mxu2 }
  0xbe   : > { %v479_v19 = vpop.f32.mrf.mxu3  ;;  %v317_v20 = vpop.f32.mrf.mxu1  ;;  %v410_v9 = vadd.f32 %v392_v18, %v315_v5 }
  0xc0   : > { %v497_v33 = vadd.f32 %v479_v19, %v410_v9 }
  0xc1   : > { %v1427_v21 = vpop.f32.mrf.mxu0 }
  0xc2   : > { %v584_v16 = vadd.f32 %v1425_v17, %v497_v33 }
  0xc5   : > { %v1429_v22 = vpop.f32.mrf.mxu2 }
  0xc6   : > { %v1431_v23 = vpop.f32.mrf.mxu3  ;;  %v1433_v24 = vpop.f32.mrf.mxu1 }
  0xc9   : > { %v1435_v25 = vpop.f32.mrf.mxu0 }
  0xcd   : > { %v1437_v26 = vpop.f32.mrf.mxu2 }
  0xce   : > { %v1439_v27 = vpop.f32.mrf.mxu3  ;;  %v1441_v28 = vpop.f32.mrf.mxu1 }
  0xd1   : > { %v1443_v29 = vpop.f32.mrf.mxu0 }
  0xd5   : > { %v1445_v30 = vpop.f32.mrf.mxu2 }
  0xd6   : > { %v1447_v31 = vpop.f32.mrf.mxu3  ;;  %v1449_v32 = vpop.f32.mrf.mxu1 }
  0xd9   : > { %v1451_v34 = vpop.f32.mrf.mxu0 }
  0xdd   : > { %v1453_v36 = vpop.f32.mrf.mxu2 }
  0xde   : > { %v1455_v38 = vpop.f32.mrf.mxu3  ;;  %v643_v39 = vpop.f32.mrf.mxu1 }
  0xdf   : > { %v667_v44 = vadd.f32 %v643_v39, %v581_v42  ;;  %v318_v39 = vadd.f32 %v317_v20, %v1407_v58  ;;  %v321_v58 = vadd.f32 %v1433_v24, %v1421_v2  ;;  %v324_v2 = vadd.f32 %v1441_v28, %v1409_v59 }
  0xe0   : > { %v327_v59 = vadd.f32 %v1449_v32, %v1423_v3 }
  0xe1   : > { %v903_v41 = vpop.f32.mrf.mxu0  ;;  %v411_v13 = vadd.f32 %v1429_v22, %v318_v39 }
  0xe3   : > { %v498_v19 = vadd.f32 %v1431_v23, %v411_v13 }
  0xe5   : > { %v730_v45 = vpop.f32.mrf.mxu2  ;;  %v585_v22 = vadd.f32 %v1427_v21, %v498_v19 }
  0xe6   : > { %v754_v47 = vadd.f32 %v730_v45, %v667_v44  ;;  %v817_v48 = vpop.f32.mrf.mxu3  ;;  %v646_v49 = vpop.f32.mrf.mxu1 }
  0xe7   : > { %v668_v61 = vadd.f32 %v646_v49, %v582_v54 }
  0xe8   : > { %v841_v51 = vadd.f32 %v817_v48, %v754_v47  ;;  %v412_v47 = vadd.f32 %v1437_v26, %v321_v58  ;;  %v413_v26 = vadd.f32 %v1445_v30, %v324_v2  ;;  %v414_v30 = vadd.f32 %v1453_v36, %v327_v59 }
  0xe9   : > { %v906_v53 = vpop.f32.mrf.mxu0 }
  0xea   : > { %v927_v57 = vadd.f32 %v903_v41, %v841_v51  ;;  %v499_v23 = vadd.f32 %v1439_v27, %v412_v47  ;;  %v500_v27 = vadd.f32 %v1447_v31, %v413_v26  ;;  %v501_v9 = vadd.f32 %v1455_v38, %v414_v30 }
  0xec   : > { %v939_v55 = vadd.f32 %v1462_v52, %v927_v57  ;;  %v586_v21 = vadd.f32 %v1435_v25, %v499_v23  ;;  %v587_v28 = vadd.f32 %v1443_v29, %v500_v27  ;;  %v588_v29 = vadd.f32 %v1451_v34, %v501_v9 }
  0xed   : > { %v733_v62 = vpop.f32.mrf.mxu2 }
  0xee   : > { %947 = vst.msk [vmem:[%s1467_s16] sm:$0xff] %vm191_vm1, %v939_v55  ;;  %v755_v0 = vadd.f32 %v733_v62, %v668_v61  ;;  %v820_v1 = vpop.f32.mrf.mxu3  ;;  %v649_v4 = vpop.f32.mrf.mxu1 }
  0xef   : > { %v669_v11 = vadd.f32 %v649_v4, %v583_v8 }
  0xf0   : > { %v842_v6 = vadd.f32 %v820_v1, %v755_v0 }
  0xf1   : > { %v909_v7 = vpop.f32.mrf.mxu0 }
  0xf2   : > { %v928_v10 = vadd.f32 %v906_v53, %v842_v6 }
  0xf4   : > { %v940_v12 = vadd.f32 %v1462_v52, %v928_v10 }
  0xf5   : > { %v736_v14 = vpop.f32.mrf.mxu2 }
  0xf6   : > { %948 = vst.msk [vmem:[%s1467_s16 + $0x8] sm:$0xff] %vm191_vm1, %v940_v12  ;;  %v756_v15 = vadd.f32 %v736_v14, %v669_v11  ;;  %v823_v35 = vpop.f32.mrf.mxu3  ;;  %v652_v37 = vpop.f32.mrf.mxu1 }
  0xf7   : > { %v670_v41 = vadd.f32 %v652_v37, %v584_v16 }
  0xf8   : > { %v843_v40 = vadd.f32 %v823_v35, %v756_v15 }
  0xf9   : > { %v912_v60 = vpop.f32.mrf.mxu0 }
  0xfa   : > { %v929_v18 = vadd.f32 %v909_v7, %v843_v40 }
  0xfc   : > { %v941_v42 = vadd.f32 %v1462_v52, %v929_v18 }
  0xfd   : > { %v739_v43 = vpop.f32.mrf.mxu2 }
  0xfe   : > { %949 = vst.msk [vmem:[%s1467_s16 + $0x10] sm:$0xff] %vm191_vm1, %v941_v42  ;;  %v757_v44 = vadd.f32 %v739_v43, %v670_v41  ;;  %v826_v45 = vpop.f32.mrf.mxu3  ;;  %v655_v46 = vpop.f32.mrf.mxu1 }
  0xff   : > { %v671_v49 = vadd.f32 %v655_v46, %v585_v22 }
 0x100   : > { %v844_v20 = vadd.f32 %v826_v45, %v757_v44 }
 0x101   : > { %v915_v17 = vpop.f32.mrf.mxu0 }
 0x102   : > { %v930_v48 = vadd.f32 %v912_v60, %v844_v20 }
 0x104   : > { %v942_v50 = vadd.f32 %v1462_v52, %v930_v48 }
 0x105   : > { %v742_v51 = vpop.f32.mrf.mxu2 }
 0x106   : > { %950 = vst.msk [vmem:[%s1467_s16 + $0x18] sm:$0xff] %vm191_vm1, %v942_v50  ;;  %v758_v53 = vadd.f32 %v742_v51, %v671_v49  ;;  %v829_v54 = vpop.f32.mrf.mxu3  ;;  %v658_v56 = vpop.f32.mrf.mxu1 }
 0x107   : > { %v672_v55 = vadd.f32 %v658_v56, %v586_v21 }
 0x108   : > { %v845_v24 = vadd.f32 %v829_v54, %v758_v53 }
 0x109   : > { %v918_v61 = vpop.f32.mrf.mxu0 }
 0x10a   : > { %v931_v57 = vadd.f32 %v915_v17, %v845_v24 }
 0x10c   : > { %v943_v62 = vadd.f32 %v1462_v52, %v931_v57 }
 0x10d   : > { %v745_v63 = vpop.f32.mrf.mxu2 }
 0x10e   : > { %951 = vst.msk [vmem:[%s1467_s16 + $0x20] sm:$0xff] %vm191_vm1, %v943_v62  ;;  %v759_v0 = vadd.f32 %v745_v63, %v672_v55  ;;  %v832_v1 = vpop.f32.mrf.mxu3  ;;  %v661_v4 = vpop.f32.mrf.mxu1 }
 0x10f   : > { %v673_v6 = vadd.f32 %v661_v4, %v587_v28 }
 0x110   : > { %v846_v25 = vadd.f32 %v832_v1, %v759_v0 }
 0x111   : > { %v921_v31 = vpop.f32.mrf.mxu0 }
 0x112   : > { %v932_v5 = vadd.f32 %v918_v61, %v846_v25 }
 0x114   : > { %v944_v7 = vadd.f32 %v1462_v52, %v932_v5 }
 0x115   : > { %v748_v8 = vpop.f32.mrf.mxu2 }
 0x116   : > { %952 = vst.msk [vmem:[%s1467_s16 + $0x28] sm:$0xff] %vm191_vm1, %v944_v7  ;;  %v760_v10 = vadd.f32 %v748_v8, %v673_v6  ;;  %v835_v11 = vpop.f32.mrf.mxu3  ;;  %v664_v32 = vpop.f32.mrf.mxu1 }
 0x117   : > { %v674_v36 = vadd.f32 %v664_v32, %v588_v29 }
 0x118   : > { %v847_v3 = vadd.f32 %v835_v11, %v760_v10 }
 0x119   : > { %v924_v37 = vpop.f32.mrf.mxu0 }
 0x11a   : > { %v933_v12 = vadd.f32 %v921_v31, %v847_v3 }
 0x11c   : > { %v945_v14 = vadd.f32 %v1462_v52, %v933_v12 }
 0x11d   : > { %v751_v33 = vpop.f32.mrf.mxu2 }
 0x11e   : > { %953 = vst.msk [vmem:[%s1467_s16 + $0x30] sm:$0xff] %vm191_vm1, %v945_v14  ;;  %v761_v15 = vadd.f32 %v751_v33, %v674_v36  ;;  %v838_v35 = vpop.f32.mrf.mxu3 }
 0x120   : > { %v848_v38 = vadd.f32 %v838_v35, %v761_v15 }
 0x122   : > { %v934_v39 = vadd.f32 %v924_v37, %v848_v38 }
 0x124   : > { %v946_v40 = vadd.f32 %v1462_v52, %v934_v39 }
 0x126   : > { %954 = vst.msk [vmem:[%s1467_s16 + $0x38] sm:$0xff] %vm191_vm1, %v946_v40 }
 0x127 PF: > { %s13_s12 = sadd.s32 1, %s1185_s12  }
 0x128   : > { %p10_p4 = scmp.ge.s32.totalorder %s13_s12, 4  }
 0x12a   :  { %12 = sbr.rel (!%p10_p4) target bundleno = 1 (0x1), region = 75 }

</bundles_post_ra>
